<compile_context>
chip_gen: v7x
topology: tpu7x:2x2x1
jax: 0.10.0
libtpu: 0.0.40
codegen_flags: <defaults>
</compile_context>

<pallas_src>
import functools

import jax
import jax.numpy as jnp
from jax import lax
from jax.experimental import pallas as pl
from jax.experimental.pallas import tpu as pltpu

MARGIN = 2.0
EPS = 1e-6  # F.pairwise_distance default eps (added to the difference, as in PyTorch)


def _round_up(x, m):
    return ((x + m - 1) // m) * m


def _cdiv(a, b):
    return (a + b - 1) // b


def _contrastive_kernel(o1_ref, o2_ref, lab_ref, out_ref, acc_ref, *,
                        n_valid, margin, t_blocks, tile_n, mask_rows):
    p = pl.program_id(0)   # parallel axis (megacore split on v7x)
    t = pl.program_id(1)   # reduction axis over row tiles

    @pl.when(t == 0)
    def _():
        acc_ref[...] = jnp.zeros_like(acc_ref)

    x1 = o1_ref[...].astype(jnp.float32)     # (tile_n, D)  -- true D, no padding
    x2 = o2_ref[...].astype(jnp.float32)     # (tile_n, D)
    lab = lab_ref[...].astype(jnp.float32)   # (tile_n, 1)

    diff = x1 - x2 + EPS                     # PyTorch adds eps to the difference
    # Narrow (tile_n, 1) column math from here on (EUP sqrt is free while streaming).
    sq_dist = jnp.sum(diff * diff, axis=-1, keepdims=True)   # (tile_n, 1)
    dist = jnp.sqrt(sq_dist)
    hinge = jnp.maximum(margin - dist, 0.0)
    # Exact arithmetic form (handles non-binary labels like the PyTorch module).
    per_row = (1.0 - lab) * sq_dist + lab * (hinge * hinge)  # (tile_n, 1)

    if mask_rows:
        # Mask rows of the ragged last block / fully-redundant clamped blocks.
        row0 = (p * t_blocks + t) * tile_n
        row = row0 + lax.broadcasted_iota(jnp.int32, per_row.shape, 0)
        per_row = jnp.where(row < n_valid, per_row, 0.0)

    # Wide accumulator: defer the cross-sublane reduce to the final flush.
    acc_ref[...] += per_row

    @pl.when(t == t_blocks - 1)
    def _():
        total = jnp.sum(acc_ref[...], axis=0, keepdims=True)     # (1, 1)
        out_ref[...] = jnp.broadcast_to(total, out_ref.shape)    # lane-dense flush


def contrastive_loss(output1, output2, label, *, margin=MARGIN, tile_n=None,
                     p_parts=None):
    """output1, output2: (N, D); label: (N, 1) or (N,). Returns scalar float32."""
    n, d = output1.shape
    if label.ndim == 1:
        label = label.reshape(n, 1)

    feat_itemsize = jnp.dtype(output1.dtype).itemsize
    lab_itemsize = jnp.dtype(label.dtype).itemsize
    min_itemsize = min(feat_itemsize, jnp.dtype(output2.dtype).itemsize, lab_itemsize)
    sub = 8 * (4 // min_itemsize)          # sublane packing: 8 f32, 16 bf16, 32 int8/fp8

    # --- generation-aware VMEM budgets (v7x: 64 MiB; v5e/v6e: 128 MiB) ---
    try:
        vmem_cap = int(pltpu.get_tpu_info().vmem_capacity_bytes)
    except Exception:
        vmem_cap = 64 * 1024 * 1024        # conservative fallback (v7x-sized)
    vmem_limit = min((vmem_cap * 3) // 4, 100 * 1024 * 1024)   # ~48 MiB v7x, ~96 MiB v6e
    buffer_budget = (vmem_cap * 3) // 8                        # ~24 MiB v7x, ~48 MiB v6e

    # --- parallel split: 2 TensorCores on v7x, 1 on v5e/v6e ---
    try:
        kind = jax.devices()[0].device_kind.lower()
    except Exception:
        kind = ""
    n_cores = 2 if "v7" in kind else 1

    # --- tile sizing (VMEM blocks are lane-padded to 128; HBM streams true D) ---
    d_lanes = _round_up(d, 128)
    per_row_vmem = (2 * 2 * d_lanes * feat_itemsize   # 2 feature streams x 2 buffers
                    + 2 * 128 * lab_itemsize          # lane-padded (tile_n,1) label bufs
                    + 128 * 4)                        # (tile_n,1) f32 accumulator scratch
    if tile_n is None:
        hbm_target = 4 * 1024 * 1024                  # ~1-4 MiB HBM bytes per feature block
        tile_n = min(buffer_budget // per_row_vmem,
                     max(sub, hbm_target // max(1, d * feat_itemsize)))
    tile_n = min(int(tile_n), _round_up(n, sub))
    tile_n = max(sub, (tile_n // sub) * sub)

    num_blocks = _cdiv(n, tile_n)
    if p_parts is None:
        p_parts = n_cores if num_blocks >= n_cores else 1
    p_parts = max(1, int(p_parts))
    t_blocks = _cdiv(num_blocks, p_parts)
    mask_rows = (p_parts * t_blocks * tile_n != n)
    last_block = num_blocks - 1

    def row_block_map(pi, ti):
        # Clamp so redundant trailing blocks of the parallel split never DMA
        # past the array; their rows are fully masked in-kernel.
        return (jnp.minimum(pi * t_blocks + ti, last_block), 0)

    kernel = functools.partial(
        _contrastive_kernel,
        n_valid=n, margin=float(margin),
        t_blocks=t_blocks, tile_n=tile_n, mask_rows=mask_rows)

    cost = pl.CostEstimate(
        flops=int(4 * n * d + 8 * n),
        transcendentals=int(n),
        bytes_accessed=int(2 * n * d * feat_itemsize + n * lab_itemsize
                           + p_parts * 8 * 128 * 4),
    )

    out = pl.pallas_call(
        kernel,
        out_shape=jax.ShapeDtypeStruct((p_parts * 8, 128), jnp.float32),
        grid_spec=pltpu.PrefetchScalarGridSpec(
            num_scalar_prefetch=0,
            grid=(p_parts, t_blocks),
            in_specs=[
                pl.BlockSpec((tile_n, d), row_block_map),
                pl.BlockSpec((tile_n, d), row_block_map),
                pl.BlockSpec((tile_n, 1), row_block_map),
            ],
            # One lane-dense (8,128) block per parallel slice; resident across t.
            out_specs=pl.BlockSpec((8, 128), lambda pi, ti: (pi, 0)),
            scratch_shapes=[pltpu.VMEM((tile_n, 1), jnp.float32)],
        ),
        compiler_params=pltpu.CompilerParams(
            dimension_semantics=("parallel", "arbitrary"),
            vmem_limit_bytes=int(vmem_limit),
        ),
        cost_estimate=cost,
    )(output1, output2, label)

    # One partial sum per parallel slice (element [8*p, 0] of its block).
    partials = out[::8, 0]
    return jnp.sum(partials) / jnp.float32(n)


def contrastive_loss_ref(output1, output2, label):
    # Pure-JAX reference mirroring the PyTorch forward (for verification).
    diff = output1.astype(jnp.float32) - output2.astype(jnp.float32) + EPS
    d = jnp.sqrt(jnp.sum(diff * diff, axis=-1, keepdims=True))
    lab = label.astype(jnp.float32).reshape(d.shape)
    return jnp.mean((1.0 - lab) * d * d
                    + lab * jnp.square(jnp.maximum(MARGIN - d, 0.0)))


if __name__ == "__main__":
    key = jax.random.PRNGKey(0)
    k1, k2, k3 = jax.random.split(key, 3)

    # Small shapes consistent with the module: batch=8, hidden=32.
    N, D = 8, 32
    output1 = jax.random.normal(k1, (N, D), dtype=jnp.float32)
    output2 = jax.random.normal(k2, (N, D), dtype=jnp.float32)
    label = jax.random.bernoulli(k3, 0.5, (N, 1)).astype(jnp.float32)

    loss = contrastive_loss(output1, output2, label)
    jax.block_until_ready(loss)
    ref = contrastive_loss_ref(output1, output2, label)
    assert jnp.allclose(loss, ref, rtol=1e-5, atol=1e-5), (loss, ref)

    # Second check: multi-tile grid with a ragged last block (N % tile_n != 0)
    # and D not a multiple of 128 (true-D blocks, no padding).
    N2, D2 = 1000, 160
    ka, kb, kc = jax.random.split(jax.random.PRNGKey(1), 3)
    o1b = jax.random.normal(ka, (N2, D2), dtype=jnp.float32)
    o2b = jax.random.normal(kb, (N2, D2), dtype=jnp.float32)
    labb = jax.random.bernoulli(kc, 0.5, (N2, 1)).astype(jnp.float32)
    loss2 = contrastive_loss(o1b, o2b, labb, tile_n=128)
    jax.block_until_ready(loss2)
    ref2 = contrastive_loss_ref(o1b, o2b, labb)
    assert jnp.allclose(loss2, ref2, rtol=1e-4, atol=1e-5), (loss2, ref2)

    # Third check: forced 2-way parallel split with an odd block count so one
    # slice owns a fully-redundant (clamped + fully-masked) trailing block.
    loss3 = contrastive_loss(o1b, o2b, labb, tile_n=144, p_parts=2)
    jax.block_until_ready(loss3)
    assert jnp.allclose(loss3, ref2, rtol=1e-4, atol=1e-5), (loss3, ref2)

    print("KERNEL_OK")
</pallas_src>

<mosaic_0001>
module attributes {stable_mosaic.version = 11 : i64} {
  func.func @_contrastive_kernel(%arg0: i32, %arg1: i32, %arg2: memref<8x32xf32, #tpu.memory_space<vmem>>, %arg3: memref<8x32xf32, #tpu.memory_space<vmem>>, %arg4: memref<8x1xf32, #tpu.memory_space<vmem>>, %arg5: memref<8x128xf32, #tpu.memory_space<vmem>>, %arg6: memref<8x1xf32, #tpu.memory_space<vmem>>) attributes {dimension_semantics = [#tpu.dimension_semantics<parallel>, #tpu.dimension_semantics<arbitrary>], iteration_bounds = array<i64: 1, 1>, scalar_prefetch = 0 : i64, scratch_operands = 1 : i64, tpu.core_type = #tpu.core_type<tc>, window_params = [{transform_indices = @transform_0, window_bounds = array<i64: 8, 32>}, {transform_indices = @transform_1, window_bounds = array<i64: 8, 32>}, {transform_indices = @transform_2, window_bounds = array<i64: 8, 1>}, {transform_indices = @transform_3, window_bounds = array<i64: 8, 128>}]} {
    %c0_i32 = arith.constant 0 : i32
    %0 = arith.cmpi eq, %arg1, %c0_i32 : i32
    %1 = arith.extui %0 : i1 to i32
    %c0_i32_0 = arith.constant 0 : i32
    %2 = arith.cmpi ne, %1, %c0_i32_0 : i32
    scf.if %2 {
      %cst_16 = arith.constant 0.000000e+00 : f32
      %29 = vector.broadcast %cst_16 : f32 to vector<8x1xf32>
      %c0_17 = arith.constant 0 : index
      %c0_18 = arith.constant 0 : index
      %30 = vector.load %arg6[%c0_17, %c0_18] : memref<8x1xf32, #tpu.memory_space<vmem>>, vector<8x1xf32>
      tpu.vector_store %arg6[%c0_17, %c0_18], %29 {strides = array<i32>} : memref<8x1xf32, #tpu.memory_space<vmem>>, vector<8x1xf32>,
    } else {
    }
    %c0 = arith.constant 0 : index
    %c0_1 = arith.constant 0 : index
    %3 = vector.load %arg2[%c0, %c0_1] : memref<8x32xf32, #tpu.memory_space<vmem>>, vector<8x32xf32>
    %c0_2 = arith.constant 0 : index
    %c0_3 = arith.constant 0 : index
    %4 = vector.load %arg3[%c0_2, %c0_3] : memref<8x32xf32, #tpu.memory_space<vmem>>, vector<8x32xf32>
    %c0_4 = arith.constant 0 : index
    %c0_5 = arith.constant 0 : index
    %5 = vector.load %arg4[%c0_4, %c0_5] : memref<8x1xf32, #tpu.memory_space<vmem>>, vector<8x1xf32>
    %6 = arith.subf %3, %4 : vector<8x32xf32>
    %cst = arith.constant 9.99999997E-7 : f32
    %7 = vector.broadcast %cst : f32 to vector<8x32xf32>
    %8 = arith.addf %6, %7 : vector<8x32xf32>
    %9 = arith.mulf %8, %8 : vector<8x32xf32>
    %cst_6 = arith.constant dense<0.000000e+00> : vector<8xf32>
    %10 = vector.multi_reduction <add>, %9, %cst_6 [1] : vector<8x32xf32> to vector<8xf32>
    %11 = vector.shape_cast %10 : vector<8xf32> to vector<8x1xf32>
    %12 = math.sqrt %11 : vector<8x1xf32>
    %cst_7 = arith.constant 2.000000e+00 : f32
    %13 = vector.broadcast %cst_7 : f32 to vector<8x1xf32>
    %14 = arith.subf %13, %12 : vector<8x1xf32>
    %cst_8 = arith.constant 0.000000e+00 : f32
    %15 = vector.broadcast %cst_8 : f32 to vector<8x1xf32>
    %16 = arith.maximumf %14, %15 : vector<8x1xf32>
    %cst_9 = arith.constant 1.000000e+00 : f32
    %17 = vector.broadcast %cst_9 : f32 to vector<8x1xf32>
    %18 = arith.subf %17, %5 : vector<8x1xf32>
    %19 = arith.mulf %18, %11 : vector<8x1xf32>
    %20 = arith.mulf %16, %16 : vector<8x1xf32>
    %21 = arith.mulf %5, %20 : vector<8x1xf32>
    %22 = arith.addf %19, %21 : vector<8x1xf32>
    %c0_10 = arith.constant 0 : index
    %c0_11 = arith.constant 0 : index
    %23 = vector.load %arg6[%c0_10, %c0_11] : memref<8x1xf32, #tpu.memory_space<vmem>>, vector<8x1xf32>
    %24 = arith.addf %23, %22 : vector<8x1xf32>
    %c0_12 = arith.constant 0 : index
    %c0_13 = arith.constant 0 : index
    %25 = vector.load %arg6[%c0_12, %c0_13] : memref<8x1xf32, #tpu.memory_space<vmem>>, vector<8x1xf32>
    tpu.vector_store %arg6[%c0_12, %c0_13], %24 {strides = array<i32>} : memref<8x1xf32, #tpu.memory_space<vmem>>, vector<8x1xf32>,
    %c0_i32_14 = arith.constant 0 : i32
    %26 = arith.cmpi eq, %arg1, %c0_i32_14 : i32
    %27 = arith.extui %26 : i1 to i32
    %c0_i32_15 = arith.constant 0 : i32
    %28 = arith.cmpi ne, %27, %c0_i32_15 : i32
    scf.if %28 {
      %c0_16 = arith.constant 0 : index
      %c0_17 = arith.constant 0 : index
      %29 = vector.load %arg6[%c0_16, %c0_17] : memref<8x1xf32, #tpu.memory_space<vmem>>, vector<8x1xf32>
      %cst_18 = arith.constant dense<0.000000e+00> : vector<1xf32>
      %30 = vector.multi_reduction <add>, %29, %cst_18 [0] : vector<8x1xf32> to vector<1xf32>
      %31 = vector.shape_cast %30 : vector<1xf32> to vector<1x1xf32>
      %32 = vector.shape_cast %31 : vector<1x1xf32> to vector<1x1xf32>
      %33 = vector.broadcast %32 : vector<1x1xf32> to vector<8x128xf32>
      %c0_19 = arith.constant 0 : index
      %c0_20 = arith.constant 0 : index
      %34 = vector.load %arg5[%c0_19, %c0_20] : memref<8x128xf32, #tpu.memory_space<vmem>>, vector<8x128xf32>
      tpu.vector_store %arg5[%c0_19, %c0_20], %33 {strides = array<i32>} : memref<8x128xf32, #tpu.memory_space<vmem>>, vector<8x128xf32>,
    } else {
    }
    return
  }
  func.func @transform_0(%arg0: i32, %arg1: i32) -> (i32, i32) {
    %c1_i32 = arith.constant 1 : i32
    %0 = arith.muli %arg0, %c1_i32 : i32
    %1 = arith.addi %0, %arg1 : i32
    %c0_i32 = arith.constant 0 : i32
    %2 = arith.minsi %1, %c0_i32 : i32
    %c0_i32_0 = arith.constant 0 : i32
    %c0_i32_1 = arith.constant 0 : i32
    return %2, %c0_i32_0 : i32, i32
  }
  func.func @transform_1(%arg0: i32, %arg1: i32) -> (i32, i32) {
    %c1_i32 = arith.constant 1 : i32
    %0 = arith.muli %arg0, %c1_i32 : i32
    %1 = arith.addi %0, %arg1 : i32
    %c0_i32 = arith.constant 0 : i32
    %2 = arith.minsi %1, %c0_i32 : i32
    %c0_i32_0 = arith.constant 0 : i32
    %c0_i32_1 = arith.constant 0 : i32
    return %2, %c0_i32_0 : i32, i32
  }
  func.func @transform_2(%arg0: i32, %arg1: i32) -> (i32, i32) {
    %c1_i32 = arith.constant 1 : i32
    %0 = arith.muli %arg0, %c1_i32 : i32
    %1 = arith.addi %0, %arg1 : i32
    %c0_i32 = arith.constant 0 : i32
    %2 = arith.minsi %1, %c0_i32 : i32
    %c0_i32_0 = arith.constant 0 : i32
    %c0_i32_1 = arith.constant 0 : i32
    return %2, %c0_i32_0 : i32, i32
  }
  func.func @transform_3(%arg0: i32, %arg1: i32) -> (i32, i32) {
    %c0_i32 = arith.constant 0 : i32
    %c0_i32_0 = arith.constant 0 : i32
    return %arg0, %c0_i32 : i32, i32
  }
}

</mosaic_0001>

<bundles_post_ra>
// kernel: tpu_custom_call.1
= control target key start
LH: loop header
LB: loop body
LE: loop exit
PB: predicated region body
PF: predicated region fallthrough
CT: control target
= control target key end

     0   :  { %8 = vsyncpa [#allocation4], 0  ;;  %s281_s0 = inlined_call_operand.vmem [shape: f32[8,32], index: 0, kind: input, shape index: {}]   ;;  %s282_s1 = inlined_call_operand.hbm [shape: f32[8,32], index: 1, kind: input, shape index: {}]   ;;  %s283_s2 = inlined_call_operand.vmem [shape: f32[8,1], index: 2, kind: input, shape index: {}]   ;;  %s284_s3 = inlined_call_operand.hbm [shape: f32[8,128], index: 3, kind: output, shape index: {}]  }
   0x1   :  { %9 = vsyncpa [#allocation5], 0  ;;  %s224_s12 = smov [#allocation3]   ;;  %s176_s16 = scalar_lea.hbm %s282_s1, 128 }
   0x2   :  { %s33_s13 = sshll.u32 %s224_s12, 4  ;;  %p177_p0 = scmp.ne.s32.totalorder %s282_s1, %s176_s16  ;;  %s34_s13 = int_to_ptr.vmem [resolvable:$true] %s33_s13 }
   0x3   :  { %p180_p1 = scmp.lt.u32.totalorder %s176_s16, %s282_s1 }
   0x5   :  { %p182_p2 = pnand %p180_p1, %p177_p0 }
   0x7   :  { %185 = shalt.err (!%p182_p2)
}
   0x8   :  { %s186_s21 = scalar_lea.vmem %s34_s13, 128  ;;  %p191_p4 = scmp.lt.s32.totalorder %s34_s13, %s34_s13 }
   0x9   :  { %p187_p3 = scmp.ne.s32.totalorder %s34_s13, %s186_s21  ;;  %p192_p5 = scmp.lt.s32.totalorder %s186_s21, %s186_s21 }
   0xb   :  { %p193_p6 = por %p192_p5, %p191_p4 }
   0xd   :  { %p194_p7 = pnand %p193_p6, %p187_p3 }
   0xf   :  { %197 = shalt.err (!%p194_p7)
}
  0x10   :  { %36 = dma.hbm_to_vmem [thread:$0]  %s282_s1, 128, %s34_s13, [#allocation4]  }
  0x11   :  { %220 = dma.done.wait [#allocation4], 128  }
  0x12   :  { %221 = vsyncadd [#allocation4], 4294967168  ;;  %v95_v0 = vld [vmem:[%s281_s0] sm:$0xff]  ;;  %v96_v1 = vld [vmem:[#allocation3] sm:$0xff]  ;;  %vm101_vm0 = vcmask 261120   ;;  %vm93_vm1 = vcmask 7168  }
  0x13   :  { %v98_v2 = vsub.f32 %v95_v0, %v96_v1  ;;  %v225_v6 = vmov 0.0   ;;  %v226_v7 = vmov 0   ;;  %v97_v13 = vld [vmem:[%s283_s2] sm:$0xff]  ;;  %s227_s2 = smov [#allocation6]  }
  0x14   :  { %94 = vst.msk [vmem:[#allocation2] sm:$0xff] %vm93_vm1, %v225_v6  ;;  %173 = vset.pattern.permute.xlu0 %v226_v7  ;;  %v114_v16 = vsub.f32 1.0, %v97_v13  ;;  %s146_s26 = sshll.u32 %s227_s2, 4  ;;  %s147_s26 = int_to_ptr.vmem [resolvable:$true] %s146_s26 }
  0x15   :  { %v99_v3 = vadd.f32 1e-06, %v98_v2  ;;  %s198_s27 = scalar_lea.vmem %s147_s26, 128  ;;  %p203_p9 = scmp.lt.s32.totalorder %s147_s26, %s147_s26 }
  0x16   :  { %p199_p8 = scmp.ne.s32.totalorder %s147_s26, %s198_s27  ;;  %p204_p10 = scmp.lt.s32.totalorder %s198_s27, %s198_s27 }
  0x17   :  { %v100_v4 = vmul.f32 %v99_v3, %v99_v3 }
  0x18   :  { %p205_p11 = por %p204_p10, %p203_p9 }
  0x19   :  { %v102_v5 = vsel %vm101_vm0, %v100_v4, 0.0 }
  0x1a   :  { %103 = vadd.xlane.f32.xlu0 %v102_v5  ;;  %p206_p12 = pnand %p205_p11, %p199_p8 }
  0x1b   :  { %v119_v21 = vld [vmem:[#allocation2] sm:$0xff] }
  0xa7   :  { %v104_v8 = vpop.xlane.xlu0 %103 }
  0xa8   :  { %174 = vrsqrt.f32 %v104_v8  ;;  %vm107_vm2 = vcmp.eq.f32.partialorder %v104_v8, inf  ;;  %v110_v11 = vand.u32 2147483648, %v104_v8  ;;  %vm109_vm3 = vcmp.eq.f32.partialorder %v104_v8, 0.0 }
  0xa9   :  { %v115_v19 = vmul.f32 %v114_v16, %v104_v8 }
  0xb2   :  { %v175_v9 = vpop.eup %174 }
  0xb3   :  { %v106_v10 = vmul.f32 %v175_v9, %v104_v8 }
  0xb5   :  { %v108_v12 = vsel %vm107_vm2, %v104_v8, %v106_v10 }
  0xb6   :  { %v111_v14 = vsel %vm109_vm3, %v110_v11, %v108_v12 }
  0xb7   :  { %v112_v15 = vsub.f32 2.0, %v111_v14 }
  0xb9   :  { %v113_v17 = vmax.f32 %v112_v15, 0.0 }
  0xbb   :  { %v116_v18 = vmul.f32 %v113_v17, %v113_v17 }
  0xbd   :  { %v117_v20 = vmul.f32 %v116_v18, %v97_v13 }
  0xbf   :  { %v118_v22 = vadd.f32 %v117_v20, %v115_v19 }
  0xc1   :  { %v120_v23 = vadd.f32 %v119_v21, %v118_v22 }
  0xc3   :  { %122 = vst.msk [vmem:[#allocation2] sm:$0xff] %vm93_vm1, %v120_v23 }
  0xca   :  { %v126_v24 = vld [vmem:[#allocation2] sm:$0xff] }
  0xcb   :  { %v127_v25 = vsel %vm93_vm1, %v126_v24, 0.0 }
  0xcc   :  { %v128_v26 = vrot.slane %v127_v25, 4 }
  0xce   :  { %v129_v27 = vadd.f32 %v128_v26, %v127_v25 }
  0xd0   :  { %v130_v28 = vrot.slane %v129_v27, 2 }
  0xd2   :  { %v131_v29 = vadd.f32 %v130_v28, %v129_v27 }
  0xd4   :  { %v132_v30 = vrot.slane %v131_v29, 1 }
  0xd6   :  { %v133_v31 = vadd.f32 %v132_v30, %v131_v29 }
  0xd8   :  { %136 = vperm.xlu0 %173, %v133_v31  }
 0x157   :  { %v137_v32 = vpop.permute.xlu0 %136 }
 0x158   :  { %139 = vst [vmem:[#allocation6] sm:$0xff] %v137_v32 }
 0x159   :  { %209 = shalt.err (!%p206_p12)
}
 0x15a   :  { %s210_s30 = scalar_lea.hbm %s284_s3, 128 }
 0x15b   :  { %p211_p13 = scmp.ne.s32.totalorder %s284_s3, %s210_s30  ;;  %p214_p0 = scmp.lt.u32.totalorder %s210_s30, %s284_s3 }
 0x15d   :  { %p216_p1 = pnand %p214_p0, %p211_p13 }
 0x15f   :  { %219 = shalt.err (!%p216_p1)
}
 0x160   :  { %149 = dma.vmem_to_hbm [thread:$0]  %s147_s26, 128, %s284_s3, [#allocation5]  }
 0x161   :  { %222 = dma.done.wait [#allocation5], 128  }
 0x162   :  { %223 = vsyncadd [#allocation5], 4294967168 }
 0x163   :  { %153 = vsyncpa [#allocation4], 1 }
 0x164   :  { %154 = vsyncpa [#allocation5], 1 }

</bundles_post_ra>
